<compile_context>
chip_gen: v7x
topology: tpu7x:2x2x1
jax: 0.10.0
libtpu: 0.0.40
codegen_flags: <defaults>
</compile_context>

<pallas_src>
from functools import partial

import jax
import jax.numpy as jnp
from jax.experimental import pallas as pl
from jax.experimental.pallas import tpu as pltpu

SIGMA_DATA = 0.5


def _edm_kernel(c_skip_ref, c_out_ref, f_const_ref, scale_ref, w_ref, x_ref,
                d_ref, *, B, C, H, W):
    HW = H * W
    R = B * C

    xb = x_ref[...]                 # (B*C, HW)  raw rows, lane-dense
    xs = xb * scale_ref[...]        # (B*C, 1):  c_in applied to noisy rows only
    wmat = w_ref[...]               # (B*C, 9):  conv taps, tap t = dy*3 + dx

    # Border masks for the implicit zero padding of the SAME 3x3 conv, derived
    # from the flattened spatial index -> no padded HBM copy, no halo DMA.
    k = jax.lax.broadcasted_iota(jnp.int32, (R, HW), 1)
    col = k % W
    row_ok = (k >= W, None, k < (H - 1) * W)   # dy = 0, 1, 2
    col_ok = (col >= 1, None, col <= W - 2)    # dx = 0, 1, 2

    # 3 independent partial accumulators (one per kernel row) -> shorter VPU
    # dependency chains; spatial shifts go through the XLU via pltpu.roll.
    partials = []
    for dy in range(3):
        acc = None
        for dx in range(3):
            off = (dy - 1) * W + (dx - 1)
            shifted = pltpu.roll(xs, (-off) % HW, 1) if off != 0 else xs
            rm, cm = row_ok[dy], col_ok[dx]
            if rm is None:
                mask = cm
            elif cm is None:
                mask = rm
            else:
                mask = jnp.logical_and(rm, cm)
            if mask is not None:
                shifted = jnp.where(mask, shifted, 0.0)
            t = dy * 3 + dx
            wcol = wmat[:, t:t + 1]           # (B*C, 1) per-row tap weight
            term = wcol * shifted             # broadcast along lanes
            acc = term if acc is None else acc + term
        partials.append(acc)
    acc = partials[0] + partials[1] + partials[2]       # (B*C, HW)

    # Per-batch channel reduction + EDM combine (B is small and static).
    for b in range(B):
        f_x = jnp.sum(acc[b * C:(b + 1) * C, :], axis=0, keepdims=True)
        f_x = f_x + f_const_ref[b]                      # conv bias + w_t*c_noise
        x_noisy = xb[b * C:b * C + 1, :]                # UNscaled noisy channel
        # D_x = c_skip * x_noisy + c_out * F_x
        d_ref[b:b + 1, :] = c_skip_ref[b] * x_noisy + c_out_ref[b] * f_x


def edm_precond(x, sigma, conv_w, conv_b, temb_w, sigma_data=SIGMA_DATA):
    """EDMPrecond.forward with a synthetic inner model, hot path in Pallas."""
    B, C, H, W = x.shape
    HW = H * W
    x = x.astype(jnp.float32)
    sigma = sigma.astype(jnp.float32).reshape(-1)

    # Per-batch scalar coefficients (tiny glue, matches torch math exactly).
    c_skip = sigma_data ** 2 / (sigma ** 2 + sigma_data ** 2)
    c_out = sigma * sigma_data / jnp.sqrt(sigma ** 2 + sigma_data ** 2)
    c_in = 1.0 / jnp.sqrt(sigma_data ** 2 + sigma ** 2)
    c_noise = jnp.log(sigma) / 4.0
    # Fold conv bias + time-emb * c_noise into one per-batch scalar.
    f_const = (conv_b.reshape(()).astype(jnp.float32)
               + temb_w.reshape(()).astype(jnp.float32) * c_noise)   # (B,)

    # Lane-dense layouts: rows = batch*channel (fills sublanes), lanes = H*W.
    x2d = x.reshape(B * C, HW)
    w_mat = jnp.tile(conv_w.reshape(C, 9).astype(jnp.float32), (B, 1))  # (B*C, 9)
    row = jnp.arange(B * C)
    # c_in on the noisy-image row of each batch (row % C == 0), 1 elsewhere.
    scale = jnp.where(row % C == 0, c_in[row // C], 1.0).astype(
        jnp.float32).reshape(B * C, 1)

    kernel = partial(_edm_kernel, B=B, C=C, H=H, W=W)
    smem = pl.BlockSpec(memory_space=pltpu.SMEM)

    out = pl.pallas_call(
        kernel,
        out_shape=jax.ShapeDtypeStruct((B, HW), jnp.float32),
        grid=(1,),
        in_specs=[
            smem,                                            # c_skip  (B,)
            smem,                                            # c_out   (B,)
            smem,                                            # f_const (B,)
            pl.BlockSpec((B * C, 1), lambda i: (0, 0)),      # per-row c_in scale
            pl.BlockSpec((B * C, 9), lambda i: (0, 0)),      # conv taps
            pl.BlockSpec((B * C, HW), lambda i: (0, 0)),     # x, lane-dense
        ],
        out_specs=pl.BlockSpec((B, HW), lambda i: (0, 0)),
    )(c_skip, c_out, f_const, scale, w_mat, x2d)
    return out.reshape(B, 1, H, W)


def edm_precond_ref(x, sigma, conv_w, conv_b, temb_w, sigma_data=SIGMA_DATA):
    """Pure-JAX reference matching the PyTorch forward semantics."""
    x = x.astype(jnp.float32)
    sigma = sigma.astype(jnp.float32).reshape(-1, 1, 1, 1)
    c_skip = sigma_data ** 2 / (sigma ** 2 + sigma_data ** 2)
    c_out = sigma * sigma_data / jnp.sqrt(sigma ** 2 + sigma_data ** 2)
    c_in = 1.0 / jnp.sqrt(sigma_data ** 2 + sigma ** 2)
    c_noise = jnp.log(sigma) / 4.0
    x_noisy = x[:, 0:1]
    x_cond = x[:, 1:]
    model_in = jnp.concatenate([x_noisy * c_in, x_cond], axis=1)
    f = jax.lax.conv_general_dilated(
        model_in, conv_w, window_strides=(1, 1), padding="SAME",
        dimension_numbers=("NCHW", "OIHW", "NCHW"))
    f = f + conv_b.reshape(1, 1, 1, 1) + temb_w.reshape(1, 1, 1, 1) * c_noise
    return c_skip * x_noisy + c_out * f


if __name__ == "__main__":
    key = jax.random.PRNGKey(0)
    k1, k2, k3, k4, k5 = jax.random.split(key, 5)

    B, C, H, W = 2, 4, 16, 16  # channel 0 = noisy image, channels 1..3 = condition
    x = jax.random.normal(k1, (B, C, H, W), dtype=jnp.float32)
    sigma = jnp.exp(jax.random.normal(k2, (B,), dtype=jnp.float32))

    # Deterministic synthetic stand-in model parameters.
    conv_w = 0.1 * jax.random.normal(k3, (1, C, 3, 3), dtype=jnp.float32)
    conv_b = 0.05 * jax.random.normal(k4, (1,), dtype=jnp.float32)
    temb_w = 0.05 * jax.random.normal(k5, (1,), dtype=jnp.float32)

    d_x = edm_precond(x, sigma, conv_w, conv_b, temb_w)
    jax.block_until_ready(d_x)

    ref = edm_precond_ref(x, sigma, conv_w, conv_b, temb_w)
    assert d_x.shape == (B, 1, H, W) and d_x.dtype == jnp.float32
    assert jnp.allclose(d_x, ref, atol=1e-4, rtol=1e-4), "mismatch vs reference"

    print("KERNEL_OK")
</pallas_src>

<mosaic_0001>
module attributes {stable_mosaic.version = 11 : i64} {
  func.func @_edm_kernel(%arg0: i32, %arg1: memref<2xf32, #tpu.memory_space<smem>>, %arg2: memref<2xf32, #tpu.memory_space<smem>>, %arg3: memref<2xf32, #tpu.memory_space<smem>>, %arg4: memref<8x1xf32, #tpu.memory_space<vmem>>, %arg5: memref<8x9xf32, #tpu.memory_space<vmem>>, %arg6: memref<8x256xf32, #tpu.memory_space<vmem>>, %arg7: memref<2x256xf32, #tpu.memory_space<vmem>>) attributes {dimension_semantics = [#tpu.dimension_semantics<arbitrary>], iteration_bounds = array<i64: 1>, scalar_prefetch = 0 : i64, scratch_operands = 0 : i64, tpu.core_type = #tpu.core_type<tc>, window_params = [{transform_indices = @transform_0, window_bounds = array<i64: 2>}, {transform_indices = @transform_1, window_bounds = array<i64: 2>}, {transform_indices = @transform_2, window_bounds = array<i64: 2>}, {pipeline_mode = #tpu.pipeline_mode<synchronous>, transform_indices = @transform_3, window_bounds = array<i64: 8, 1>}, {pipeline_mode = #tpu.pipeline_mode<synchronous>, transform_indices = @transform_4, window_bounds = array<i64: 8, 9>}, {pipeline_mode = #tpu.pipeline_mode<synchronous>, transform_indices = @transform_5, window_bounds = array<i64: 8, 256>}, {pipeline_mode = #tpu.pipeline_mode<synchronous>, transform_indices = @transform_6, window_bounds = array<i64: 2, 256>}]} {
    %c0 = arith.constant 0 : index
    %c0_0 = arith.constant 0 : index
    %0 = vector.load %arg6[%c0, %c0_0] : memref<8x256xf32, #tpu.memory_space<vmem>>, vector<8x256xf32>
    %c0_1 = arith.constant 0 : index
    %c0_2 = arith.constant 0 : index
    %1 = vector.load %arg4[%c0_1, %c0_2] : memref<8x1xf32, #tpu.memory_space<vmem>>, vector<8x1xf32>
    %2 = vector.broadcast %1 : vector<8x1xf32> to vector<8x256xf32>
    %3 = arith.mulf %0, %2 : vector<8x256xf32>
    %c0_3 = arith.constant 0 : index
    %c0_4 = arith.constant 0 : index
    %4 = vector.load %arg5[%c0_3, %c0_4] : memref<8x9xf32, #tpu.memory_space<vmem>>, vector<8x9xf32>
    %5 = tpu.iota {dimensions = array<i32: 1>} : vector<8x256xi32>
    %c16_i32 = arith.constant 16 : i32
    %c0_i32 = arith.constant 0 : i32
    %6 = arith.cmpi eq, %c16_i32, %c0_i32 : i32
    %c1_i32 = arith.constant 1 : i32
    %7 = arith.select %6, %c1_i32, %c16_i32 : i32
    %8 = vector.broadcast %7 : i32 to vector<8x256xi32>
    %9 = arith.remsi %5, %8 : vector<8x256xi32>
    %c0_i32_5 = arith.constant 0 : i32
    %10 = vector.broadcast %c0_i32_5 : i32 to vector<8x256xi32>
    %11 = arith.cmpi ne, %9, %10 : vector<8x256xi32>
    %c0_i32_6 = arith.constant 0 : i32
    %12 = vector.broadcast %c0_i32_6 : i32 to vector<8x256xi32>
    %13 = arith.cmpi slt, %9, %12 : vector<8x256xi32>
    %c0_i32_7 = arith.constant 0 : i32
    %14 = arith.cmpi slt, %7, %c0_i32_7 : i32
    %15 = vector.broadcast %14 : i1 to vector<8x256xi1>
    %16 = vector.broadcast %15 : vector<8x256xi1> to vector<8x256xi1>
    %17 = arith.xori %13, %16 : vector<8x256xi1>
    %18 = arith.andi %17, %11 : vector<8x256xi1>
    %19 = vector.broadcast %7 : i32 to vector<8x256xi32>
    %20 = arith.addi %9, %19 : vector<8x256xi32>
    %21 = arith.select %18, %20, %9 : vector<8x256xi1>, vector<8x256xi32>
    %c16_i32_8 = arith.constant 16 : i32
    %22 = vector.broadcast %c16_i32_8 : i32 to vector<8x256xi32>
    %23 = arith.cmpi sge, %5, %22 : vector<8x256xi32>
    %c240_i32 = arith.constant 240 : i32
    %24 = vector.broadcast %c240_i32 : i32 to vector<8x256xi32>
    %25 = arith.cmpi slt, %5, %24 : vector<8x256xi32>
    %c1_i32_9 = arith.constant 1 : i32
    %26 = vector.broadcast %c1_i32_9 : i32 to vector<8x256xi32>
    %27 = arith.cmpi sge, %21, %26 : vector<8x256xi32>
    %c14_i32 = arith.constant 14 : i32
    %28 = vector.broadcast %c14_i32 : i32 to vector<8x256xi32>
    %29 = arith.cmpi sle, %21, %28 : vector<8x256xi32>
    %c17_i32 = arith.constant 17 : i32
    %30 = tpu.dynamic_rotate %3 by %c17_i32 dim 1 : vector<8x256xf32>, i32 -> vector<8x256xf32>
    %31 = arith.andi %23, %27 : vector<8x256xi1>
    %cst = arith.constant 0.000000e+00 : f32
    %32 = vector.broadcast %cst : f32 to vector<8x256xf32>
    %33 = arith.select %31, %30, %32 : vector<8x256xi1>, vector<8x256xf32>
    %34 = vector.extract_strided_slice %4 {offsets = [0, 0], sizes = [8, 1], strides = [1, 1]} : vector<8x9xf32> to vector<8x1xf32>
    %35 = vector.broadcast %34 : vector<8x1xf32> to vector<8x256xf32>
    %36 = arith.mulf %35, %33 : vector<8x256xf32>
    %c16_i32_10 = arith.constant 16 : i32
    %37 = tpu.dynamic_rotate %3 by %c16_i32_10 dim 1 : vector<8x256xf32>, i32 -> vector<8x256xf32>
    %cst_11 = arith.constant 0.000000e+00 : f32
    %38 = vector.broadcast %cst_11 : f32 to vector<8x256xf32>
    %39 = arith.select %23, %37, %38 : vector<8x256xi1>, vector<8x256xf32>
    %40 = vector.extract_strided_slice %4 {offsets = [0, 1], sizes = [8, 1], strides = [1, 1]} : vector<8x9xf32> to vector<8x1xf32>
    %41 = vector.broadcast %40 : vector<8x1xf32> to vector<8x256xf32>
    %42 = arith.mulf %41, %39 : vector<8x256xf32>
    %43 = arith.addf %36, %42 : vector<8x256xf32>
    %c15_i32 = arith.constant 15 : i32
    %44 = tpu.dynamic_rotate %3 by %c15_i32 dim 1 : vector<8x256xf32>, i32 -> vector<8x256xf32>
    %45 = arith.andi %23, %29 : vector<8x256xi1>
    %cst_12 = arith.constant 0.000000e+00 : f32
    %46 = vector.broadcast %cst_12 : f32 to vector<8x256xf32>
    %47 = arith.select %45, %44, %46 : vector<8x256xi1>, vector<8x256xf32>
    %48 = vector.extract_strided_slice %4 {offsets = [0, 2], sizes = [8, 1], strides = [1, 1]} : vector<8x9xf32> to vector<8x1xf32>
    %49 = vector.broadcast %48 : vector<8x1xf32> to vector<8x256xf32>
    %50 = arith.mulf %49, %47 : vector<8x256xf32>
    %51 = arith.addf %43, %50 : vector<8x256xf32>
    %c1_i32_13 = arith.constant 1 : i32
    %52 = tpu.dynamic_rotate %3 by %c1_i32_13 dim 1 : vector<8x256xf32>, i32 -> vector<8x256xf32>
    %cst_14 = arith.constant 0.000000e+00 : f32
    %53 = vector.broadcast %cst_14 : f32 to vector<8x256xf32>
    %54 = arith.select %27, %52, %53 : vector<8x256xi1>, vector<8x256xf32>
    %55 = vector.extract_strided_slice %4 {offsets = [0, 3], sizes = [8, 1], strides = [1, 1]} : vector<8x9xf32> to vector<8x1xf32>
    %56 = vector.broadcast %55 : vector<8x1xf32> to vector<8x256xf32>
    %57 = arith.mulf %56, %54 : vector<8x256xf32>
    %58 = vector.extract_strided_slice %4 {offsets = [0, 4], sizes = [8, 1], strides = [1, 1]} : vector<8x9xf32> to vector<8x1xf32>
    %59 = vector.broadcast %58 : vector<8x1xf32> to vector<8x256xf32>
    %60 = arith.mulf %59, %3 : vector<8x256xf32>
    %61 = arith.addf %57, %60 : vector<8x256xf32>
    %c255_i32 = arith.constant 255 : i32
    %62 = tpu.dynamic_rotate %3 by %c255_i32 dim 1 : vector<8x256xf32>, i32 -> vector<8x256xf32>
    %cst_15 = arith.constant 0.000000e+00 : f32
    %63 = vector.broadcast %cst_15 : f32 to vector<8x256xf32>
    %64 = arith.select %29, %62, %63 : vector<8x256xi1>, vector<8x256xf32>
    %65 = vector.extract_strided_slice %4 {offsets = [0, 5], sizes = [8, 1], strides = [1, 1]} : vector<8x9xf32> to vector<8x1xf32>
    %66 = vector.broadcast %65 : vector<8x1xf32> to vector<8x256xf32>
    %67 = arith.mulf %66, %64 : vector<8x256xf32>
    %68 = arith.addf %61, %67 : vector<8x256xf32>
    %c241_i32 = arith.constant 241 : i32
    %69 = tpu.dynamic_rotate %3 by %c241_i32 dim 1 : vector<8x256xf32>, i32 -> vector<8x256xf32>
    %70 = arith.andi %25, %27 : vector<8x256xi1>
    %cst_16 = arith.constant 0.000000e+00 : f32
    %71 = vector.broadcast %cst_16 : f32 to vector<8x256xf32>
    %72 = arith.select %70, %69, %71 : vector<8x256xi1>, vector<8x256xf32>
    %73 = vector.extract_strided_slice %4 {offsets = [0, 6], sizes = [8, 1], strides = [1, 1]} : vector<8x9xf32> to vector<8x1xf32>
    %74 = vector.broadcast %73 : vector<8x1xf32> to vector<8x256xf32>
    %75 = arith.mulf %74, %72 : vector<8x256xf32>
    %c240_i32_17 = arith.constant 240 : i32
    %76 = tpu.dynamic_rotate %3 by %c240_i32_17 dim 1 : vector<8x256xf32>, i32 -> vector<8x256xf32>
    %cst_18 = arith.constant 0.000000e+00 : f32
    %77 = vector.broadcast %cst_18 : f32 to vector<8x256xf32>
    %78 = arith.select %25, %76, %77 : vector<8x256xi1>, vector<8x256xf32>
    %79 = vector.extract_strided_slice %4 {offsets = [0, 7], sizes = [8, 1], strides = [1, 1]} : vector<8x9xf32> to vector<8x1xf32>
    %80 = vector.broadcast %79 : vector<8x1xf32> to vector<8x256xf32>
    %81 = arith.mulf %80, %78 : vector<8x256xf32>
    %82 = arith.addf %75, %81 : vector<8x256xf32>
    %c239_i32 = arith.constant 239 : i32
    %83 = tpu.dynamic_rotate %3 by %c239_i32 dim 1 : vector<8x256xf32>, i32 -> vector<8x256xf32>
    %84 = arith.andi %25, %29 : vector<8x256xi1>
    %cst_19 = arith.constant 0.000000e+00 : f32
    %85 = vector.broadcast %cst_19 : f32 to vector<8x256xf32>
    %86 = arith.select %84, %83, %85 : vector<8x256xi1>, vector<8x256xf32>
    %87 = vector.extract_strided_slice %4 {offsets = [0, 8], sizes = [8, 1], strides = [1, 1]} : vector<8x9xf32> to vector<8x1xf32>
    %88 = vector.broadcast %87 : vector<8x1xf32> to vector<8x256xf32>
    %89 = arith.mulf %88, %86 : vector<8x256xf32>
    %90 = arith.addf %82, %89 : vector<8x256xf32>
    %91 = arith.addf %51, %68 : vector<8x256xf32>
    %92 = arith.addf %91, %90 : vector<8x256xf32>
    %93 = vector.extract_strided_slice %92 {offsets = [0, 0], sizes = [4, 256], strides = [1, 1]} : vector<8x256xf32> to vector<4x256xf32>
    %cst_20 = arith.constant dense<0.000000e+00> : vector<256xf32>
    %94 = vector.multi_reduction <add>, %93, %cst_20 [0] : vector<4x256xf32> to vector<256xf32>
    %95 = vector.shape_cast %94 : vector<256xf32> to vector<1x256xf32>
    %c0_21 = arith.constant 0 : index
    %96 = memref.load %arg3[%c0_21] : memref<2xf32, #tpu.memory_space<smem>>
    %97 = vector.broadcast %96 : f32 to vector<1x256xf32>
    %98 = arith.addf %95, %97 : vector<1x256xf32>
    %99 = vector.extract_strided_slice %0 {offsets = [0, 0], sizes = [1, 256], strides = [1, 1]} : vector<8x256xf32> to vector<1x256xf32>
    %c0_22 = arith.constant 0 : index
    %100 = memref.load %arg1[%c0_22] : memref<2xf32, #tpu.memory_space<smem>>
    %101 = vector.broadcast %100 : f32 to vector<1x256xf32>
    %102 = arith.mulf %101, %99 : vector<1x256xf32>
    %c0_23 = arith.constant 0 : index
    %103 = memref.load %arg2[%c0_23] : memref<2xf32, #tpu.memory_space<smem>>
    %104 = vector.broadcast %103 : f32 to vector<1x256xf32>
    %105 = arith.mulf %104, %98 : vector<1x256xf32>
    %106 = arith.addf %102, %105 : vector<1x256xf32>
    %c0_24 = arith.constant 0 : index
    %c0_25 = arith.constant 0 : index
    %107 = vector.load %arg7[%c0_24, %c0_25] : memref<2x256xf32, #tpu.memory_space<vmem>>, vector<1x256xf32>
    tpu.vector_store %arg7[%c0_24, %c0_25], %106 {strides = array<i32>} : memref<2x256xf32, #tpu.memory_space<vmem>>, vector<1x256xf32>,
    %108 = vector.extract_strided_slice %92 {offsets = [4, 0], sizes = [4, 256], strides = [1, 1]} : vector<8x256xf32> to vector<4x256xf32>
    %cst_26 = arith.constant dense<0.000000e+00> : vector<256xf32>
    %109 = vector.multi_reduction <add>, %108, %cst_26 [0] : vector<4x256xf32> to vector<256xf32>
    %110 = vector.shape_cast %109 : vector<256xf32> to vector<1x256xf32>
    %c1 = arith.constant 1 : index
    %111 = memref.load %arg3[%c1] : memref<2xf32, #tpu.memory_space<smem>>
    %112 = vector.broadcast %111 : f32 to vector<1x256xf32>
    %113 = arith.addf %110, %112 : vector<1x256xf32>
    %114 = vector.extract_strided_slice %0 {offsets = [4, 0], sizes = [1, 256], strides = [1, 1]} : vector<8x256xf32> to vector<1x256xf32>
    %c1_27 = arith.constant 1 : index
    %115 = memref.load %arg1[%c1_27] : memref<2xf32, #tpu.memory_space<smem>>
    %116 = vector.broadcast %115 : f32 to vector<1x256xf32>
    %117 = arith.mulf %116, %114 : vector<1x256xf32>
    %c1_28 = arith.constant 1 : index
    %118 = memref.load %arg2[%c1_28] : memref<2xf32, #tpu.memory_space<smem>>
    %119 = vector.broadcast %118 : f32 to vector<1x256xf32>
    %120 = arith.mulf %119, %113 : vector<1x256xf32>
    %121 = arith.addf %117, %120 : vector<1x256xf32>
    %c1_29 = arith.constant 1 : index
    %c0_30 = arith.constant 0 : index
    %122 = vector.load %arg7[%c1_29, %c0_30] : memref<2x256xf32, #tpu.memory_space<vmem>>, vector<1x256xf32>
    tpu.vector_store %arg7[%c1_29, %c0_30], %121 {strides = array<i32>} : memref<2x256xf32, #tpu.memory_space<vmem>>, vector<1x256xf32>,
    return
  }
  func.func @transform_0(%arg0: i32) -> i32 {
    %c0_i32 = arith.constant 0 : i32
    %c0_i32_0 = arith.constant 0 : i32
    return %c0_i32 : i32
  }
  func.func @transform_1(%arg0: i32) -> i32 {
    %c0_i32 = arith.constant 0 : i32
    %c0_i32_0 = arith.constant 0 : i32
    return %c0_i32 : i32
  }
  func.func @transform_2(%arg0: i32) -> i32 {
    %c0_i32 = arith.constant 0 : i32
    %c0_i32_0 = arith.constant 0 : i32
    return %c0_i32 : i32
  }
  func.func @transform_3(%arg0: i32) -> (i32, i32) {
    %c0_i32 = arith.constant 0 : i32
    %c0_i32_0 = arith.constant 0 : i32
    %c0_i32_1 = arith.constant 0 : i32
    return %c0_i32, %c0_i32_0 : i32, i32
  }
  func.func @transform_4(%arg0: i32) -> (i32, i32) {
    %c0_i32 = arith.constant 0 : i32
    %c0_i32_0 = arith.constant 0 : i32
    %c0_i32_1 = arith.constant 0 : i32
    return %c0_i32, %c0_i32_0 : i32, i32
  }
  func.func @transform_5(%arg0: i32) -> (i32, i32) {
    %c0_i32 = arith.constant 0 : i32
    %c0_i32_0 = arith.constant 0 : i32
    %c0_i32_1 = arith.constant 0 : i32
    return %c0_i32, %c0_i32_0 : i32, i32
  }
  func.func @transform_6(%arg0: i32) -> (i32, i32) {
    %c0_i32 = arith.constant 0 : i32
    %c0_i32_0 = arith.constant 0 : i32
    %c0_i32_1 = arith.constant 0 : i32
    return %c0_i32, %c0_i32_0 : i32, i32
  }
}

</mosaic_0001>

<bundles_post_ra>
// kernel: tpu_custom_call.1
= control target key start
LH: loop header
LB: loop body
LE: loop exit
PB: predicated region body
PF: predicated region fallthrough
CT: control target
= control target key end

     0   :  { %11 = vsyncpa [#allocation5], 0  ;;  %s767_s0 = inlined_call_operand.vmem [shape: f32[2], index: 0, kind: input, shape index: {}]   ;;  %s768_s1 = inlined_call_operand.vmem [shape: f32[2], index: 1, kind: input, shape index: {}]   ;;  %s769_s2 = inlined_call_operand.hbm [shape: f32[2], index: 2, kind: input, shape index: {}]   ;;  %s770_s3 = inlined_call_operand.vmem [shape: f32[8,1], index: 3, kind: input, shape index: {}]   ;;  %s771_s4 = inlined_call_operand.vmem [shape: f32[8,9], index: 4, kind: input, shape index: {}]   ;;  %s772_s5 = inlined_call_operand.vmem [shape: f32[8,256], index: 5, kind: input, shape index: {}]   ;;  %s773_s6 = inlined_call_operand.hbm [shape: f32[2,256], index: 6, kind: output, shape index: {}]  }
   0x1   :  { %12 = vsyncpa [#allocation7], 0 }
   0x2   :  { %13 = vsyncpa [#allocation4], 0 }
   0x3   :  { %14 = vsyncpa [#allocation3], 0  ;;  %s21_s23 = sshll.u32 %s767_s0, 4  ;;  %s31_s26 = sshll.u32 %s768_s1, 4  ;;  %s22_s23 = int_to_ptr.vmem [resolvable:$true] %s21_s23  ;;  %s32_s26 = int_to_ptr.vmem [resolvable:$true] %s31_s26 }
   0x4   :  { %s414_s27 = scalar_lea.vmem %s22_s23, 16  ;;  %p419_p1 = scmp.lt.s32.totalorder %s22_s23, %s22_s23 }
   0x5   :  { %p415_p0 = scmp.ne.s32.totalorder %s22_s23, %s414_s27  ;;  %p420_p2 = scmp.lt.s32.totalorder %s414_s27, %s414_s27 }
   0x7   :  { %p421_p3 = por %p420_p2, %p419_p1 }
   0x9   :  { %p422_p4 = pnand %p421_p3, %p415_p0 }
   0xb   :  { %425 = shalt.err (!%p422_p4)
}
   0xc   :  { %s478_s28 = smov [#allocation2]   ;;  %s426_s29 = scalar_lea.vmem %s32_s26, 16 }
   0xd   :  { %24 = dma.vmem_to_smem %s22_s23, 16, %s478_s28, [#allocation5]  }
   0xe   :  { %p427_p5 = scmp.ne.s32.totalorder %s32_s26, %s426_s29  ;;  %p431_p6 = scmp.lt.s32.totalorder %s32_s26, %s32_s26 }
   0xf   :  { %p432_p7 = scmp.lt.s32.totalorder %s426_s29, %s426_s29 }
  0x11   :  { %p433_p8 = por %p432_p7, %p431_p6 }
  0x13   :  { %p434_p9 = pnand %p433_p8, %p427_p5 }
  0x15   :  { %437 = shalt.err (!%p434_p9)
}
  0x16   :  { %s479_s0 = smov [#allocation6]   ;;  %s438_s7 = scalar_lea.hbm %s769_s2, 16 }
  0x17   :  { %34 = dma.vmem_to_smem %s32_s26, 16, %s479_s0, [#allocation7]  }
  0x18   :  { %p439_p10 = scmp.ne.s32.totalorder %s769_s2, %s438_s7  ;;  %p442_p11 = scmp.lt.u32.totalorder %s438_s7, %s769_s2 }
  0x1a   :  { %p444_p12 = pnand %p442_p11, %p439_p10 }
  0x1c   :  { %447 = shalt.err (!%p444_p12)
}
  0x1d   :  { %s480_s12 = smov [#allocation8]  }
  0x1e   :  { %42 = dma.hbm_to_smem %s769_s2, 16, %s480_s12, [#allocation4]  }
  0x1f   :  { %470 = dma.done.wait [#allocation5], 16  }
  0x20   :  { %471 = vsyncadd [#allocation5], 4294967280 }
  0x21   :  { %472 = dma.done.wait [#allocation7], 16  }
  0x22   :  { %473 = vsyncadd [#allocation7], 4294967280 }
  0x23   :  { %474 = dma.done.wait [#allocation4], 16  }
  0x24   :  { %475 = vsyncadd [#allocation4], 4294967280 }
  0x25   :  { %58 = sfence }
  0x26   :  { %v61_v0 = vld [vmem:[%s770_s3] sm:$0xff]  ;;  %v481_v1 = vmov 0   ;;  %v482_v3 = vmov 1   ;;  %v483_v4 = vmov 3   ;;  %v484_v5 = vmov 4   ;;  %v567_v12 = vld [vmem:[%s772_s5 + $0x8] sm:$0xff] }
  0x27   :  { %404 = vset.pattern.permute.xlu0 %v481_v1  ;;  %v69_v2 = vld [vmem:[%s771_s4] sm:$0xff]  ;;  %405 = vset.pattern.permute.xlu1 %v482_v3  ;;  %v485_v6 = vmov 2   ;;  %v486_v7 = vmov 6   ;;  %v487_v8 = vmov 5   ;;  %v488_v9 = vmov 8   ;;  %s490_s20 = smov 17  }
  0x28   :  { %64 = vperm.xlu0 %404, %v61_v0   ;;  %133 = vperm.xlu1 %405, %v69_v2   ;;  %v489_v10 = vmov 7   ;;  %v562_v11 = vld [vmem:[%s772_s5] sm:$0xff]  ;;  %s491_s21 = smov 16   ;;  %s492_s22 = smov 1   ;;  %v70_v25 = vlaneseq }
  0x29   :  { %s493_s5 = smov 15   ;;  %s494_s23 = smov 127  }
  0x2a   :  { %s495_s24 = smov 113   ;;  %s496_s25 = smov 112   ;;  %v604_v28 = vand.u32 127, %v70_v25 }
  0x2b   :  { %s497_s26 = smov 111   ;;  %s731_s27 = sld [smem:[#allocation2]] }
  0x2c   :  { %118 = vperm.xlu0 %404, %v69_v2   ;;  %406 = vset.pattern.permute.xlu1 %v483_v4  ;;  %v607_v31 = vadd.s32 128, %v604_v28  ;;  %v77_v34 = vand.u32 15, %v604_v28  ;;  %vm163_vm0 = vcmp.lt.s32.totalorder %v604_v28, 1  ;;  %vm97_vm1 = vcmp.ge.s32.totalorder %v604_v28, 16  ;;  %s733_s28 = sld [smem:[#allocation2 + $0x1]]  ;;  %s735_s29 = sld [smem:[#allocation8]] }
  0x2d   :  { %169 = vperm.xlu1 %406, %v69_v2   ;;  %vm109_vm3 = vcmp.lt.s32.totalorder %v604_v28, 17  ;;  %vm127_vm5 = vcmp.lt.s32.totalorder %v604_v28, 16  ;;  %vm186_vm7 = vcmp.lt.s32.totalorder %v604_v28, 127  ;;  %vm144_vm10 = vcmp.lt.s32.totalorder %v604_v28, 15  ;;  %s737_s0 = sld [smem:[#allocation6]]  ;;  %s739_s1 = sld [smem:[#allocation8 + $0x1]] }
  0x2e   :  { %v84_v35 = vand.u32 15, %v607_v31  ;;  %vm613_vm2 = vcmp.ge.s32.totalorder %v77_v34, 1  ;;  %vm623_vm6 = vcmp.le.s32.totalorder %v77_v34, 14  ;;  %vm100_vm11 = vcmp.lt.s32.totalorder %v607_v31, 240  ;;  %s742_s30 = sld [smem:[#allocation6 + $0x1]]  ;;  %s499_s7 = smov [#allocation9]  }
  0x2f   :  { %vm632_vm8 = vmand %vm97_vm1, %vm613_vm2  ;;  %vm203_vm12 = vcmp.lt.s32.totalorder %v604_v28, 113  ;;  %vm220_vm14 = vcmp.lt.s32.totalorder %v604_v28, 112  ;;  %vm237_vm15 = vcmp.lt.s32.totalorder %v604_v28, 111  ;;  %s368_s8 = sshll.u32 %s499_s7, 4  ;;  %s369_s8 = int_to_ptr.vmem [resolvable:$true] %s368_s8 }
  0x30   :  { %407 = vset.pattern.permute.xlu0 %v484_v5  ;;  %vm618_vm4 = vcmp.ge.s32.totalorder %v84_v35, 1  ;;  %vm636_vm9 = vcmp.le.s32.totalorder %v84_v35, 14  ;;  %vm659_vm13 = vmand %vm97_vm1, %vm623_vm6  ;;  %s448_s9 = scalar_lea.vmem %s369_s8, 64  ;;  %p453_p0 = scmp.lt.s32.totalorder %s369_s8, %s369_s8 }
  0x31   :  { %175 = vperm.xlu0 %407, %v69_v2   ;;  %408 = vset.pattern.permute.xlu1 %v485_v6  ;;  %p449_p13 = scmp.ne.s32.totalorder %s369_s8, %s448_s9  ;;  %p454_p1 = scmp.lt.s32.totalorder %s448_s9, %s448_s9 }
  0x32   :  { %152 = vperm.xlu1 %408, %v69_v2  }
  0x33   :  { %p455_p2 = por %p454_p1, %p453_p0 }
  0x35   :  { %410 = vset.pattern.permute.xlu0 %v486_v7  ;;  %p456_p3 = pnand %p455_p2, %p449_p13 }
  0x36   :  { %409 = vset.pattern.permute.xlu1 %v487_v8  ;;  %211 = vperm.xlu0 %410, %v69_v2  }
  0x37   :  { %192 = vperm.xlu1 %409, %v69_v2  }
  0x3a   :  { %413 = vset.pattern.permute.xlu0 %v488_v9 }
  0x3b   :  { %411 = vset.pattern.permute.xlu1 %v489_v10 }
  0x3c   :  { %226 = vperm.xlu1 %411, %v69_v2  }
  0x40   :  { %412 = vset.pattern.permute.xlu1 %v488_v9 }
  0x41   :  { %245 = vperm.xlu1 %412, %v69_v2  }
  0xa7   :  { %v65_v13 = vpop.permute.xlu0 %64  ;;  %v591_v16 = vpop.permute.xlu1 %133 }
  0xa8   :  { %v570_v14 = vmul.f32 %v65_v13, %v562_v11  ;;  %v573_v15 = vmul.f32 %v65_v13, %v567_v12 }
  0xaa   :  { %107 = vrot.lane.b32.xlu1 %v573_v15, %s490_s20  ;;  %105 = vrot.lane.b32.xlu0 %v570_v14, %s490_s20 }
  0xab   :  { %v119_v20 = vpop.permute.xlu0 %118 }
  0xac   :  { %v170_v17 = vpop.permute.xlu1 %169 }
  0xae   :  { %125 = vrot.lane.b32.xlu1 %v573_v15, %s491_s21  ;;  %123 = vrot.lane.b32.xlu0 %v570_v14, %s491_s21 }
  0xb0   :  { %v176_v22 = vpop.permute.xlu0 %175 }
  0xb1   :  { %v593_v18 = vpop.permute.xlu1 %152  ;;  %v178_v49 = vmul.f32 %v176_v22, %v570_v14  ;;  %v179_v55 = vmul.f32 %v176_v22, %v573_v15 }
  0xb2   :  { %161 = vrot.lane.b32.xlu1 %v573_v15, %s492_s22  ;;  %159 = vrot.lane.b32.xlu0 %v570_v14, %s492_s22 }
  0xb5   :  { %v601_v24 = vpop.permute.xlu0 %211 }
  0xb6   :  { %142 = vrot.lane.b32.xlu1 %v573_v15, %s493_s5  ;;  %140 = vrot.lane.b32.xlu0 %v570_v14, %s493_s5  ;;  %v595_v19 = vpop.permute.xlu1 %192 }
  0xba   :  { %184 = vrot.lane.b32.xlu1 %v573_v15, %s494_s23  ;;  %182 = vrot.lane.b32.xlu0 %v570_v14, %s494_s23 }
  0xbb   :  { %v597_v21 = vpop.permute.xlu1 %226 }
  0xbe   :  { %201 = vrot.lane.b32.xlu1 %v573_v15, %s495_s24  ;;  %199 = vrot.lane.b32.xlu0 %v570_v14, %s495_s24 }
  0xc0   :  { %v599_v23 = vpop.permute.xlu1 %245 }
  0xc2   :  { %218 = vrot.lane.b32.xlu1 %v573_v15, %s496_s25  ;;  %216 = vrot.lane.b32.xlu0 %v570_v14, %s496_s25 }
  0xc6   :  { %235 = vrot.lane.b32.xlu1 %v573_v15, %s497_s26  ;;  %233 = vrot.lane.b32.xlu0 %v570_v14, %s497_s26 }
 0x11c   :  { %v108_v26 = vpop.permute.xlu1 %107  ;;  %v106_v27 = vpop.permute.xlu0 %105 }
 0x11d   :  { %v110_v44 = vsel %vm109_vm3, %v106_v27, %v108_v26  ;;  %v111_v45 = vsel %vm109_vm3, %v108_v26, %v106_v27  ;;  %vm305_vm3 = vcmp.lt.s32.totalorder %v70_v25, 256 }
 0x11e   :  { %v114_v56 = vsel %vm632_vm8, %v111_v45, 0.0  ;;  %v115_v57 = vsel %vm618_vm4, %v110_v44, 0.0 }
 0x11f   :  { %v121_v5 = vmul.f32 %v119_v20, %v114_v56  ;;  %v122_v6 = vmul.f32 %v119_v20, %v115_v57 }
 0x120   :  { %v126_v29 = vpop.permute.xlu1 %125  ;;  %v124_v30 = vpop.permute.xlu0 %123 }
 0x121   :  { %v129_v51 = vsel %vm127_vm5, %v126_v29, %v124_v30  ;;  %v128_v60 = vsel %vm127_vm5, %v124_v30, %v126_v29 }
 0x122   :  { %v130_v1 = vsel %vm97_vm1, %v129_v51, 0.0  ;;  %v137_v8 = vmul.f32 %v591_v16, %v128_v60  ;;  %vm715_vm1 = vmand %vm100_vm11, %vm636_vm9 }
 0x123   :  { %v136_v15 = vmul.f32 %v591_v16, %v130_v1 }
 0x124   :  { %v162_v32 = vpop.permute.xlu1 %161  ;;  %v160_v33 = vpop.permute.xlu0 %159  ;;  %v139_v38 = vadd.f32 %v137_v8, %v122_v6 }
 0x125   :  { %v165_v40 = vsel %vm163_vm0, %v162_v32, %v160_v33  ;;  %v164_v41 = vsel %vm163_vm0, %v160_v33, %v162_v32  ;;  %vm686_vm0 = vmand %vm100_vm11, %vm618_vm4 }
 0x126   :  { %v166_v50 = vsel %vm613_vm2, %v165_v40, 0.0  ;;  %v167_v52 = vsel %vm618_vm4, %v164_v41, 0.0 }
 0x127   :  { %v172_v61 = vmul.f32 %v170_v17, %v166_v50  ;;  %v173_v2 = vmul.f32 %v170_v17, %v167_v52 }
 0x128   :  { %v143_v36 = vpop.permute.xlu1 %142  ;;  %v141_v37 = vpop.permute.xlu0 %140 }
 0x129   :  { %v146_v59 = vsel %vm144_vm10, %v143_v36, %v141_v37  ;;  %v145_v62 = vsel %vm144_vm10, %v141_v37, %v143_v36  ;;  %v180_v17 = vadd.f32 %v178_v49, %v172_v61  ;;  %v181_v29 = vadd.f32 %v179_v55, %v173_v2 }
 0x12a   :  { %v149_v7 = vsel %vm659_vm13, %v146_v59, 0.0  ;;  %v150_v9 = vsel %vm636_vm9, %v145_v62, 0.0 }
 0x12b   :  { %v155_v30 = vmul.f32 %v593_v18, %v149_v7  ;;  %v156_v34 = vmul.f32 %v593_v18, %v150_v9  ;;  %v138_v18 = vadd.f32 %v136_v15, %v121_v5  ;;  %v276_v9 = vstv %s731_s27 }
 0x12c   :  { %v185_v47 = vpop.permute.xlu1 %184  ;;  %v183_v48 = vpop.permute.xlu0 %182 }
 0x12d   :  { %v187_v53 = vsel %vm186_vm7, %v183_v48, %v185_v47  ;;  %v188_v54 = vsel %vm186_vm7, %v185_v47, %v183_v48  ;;  %v157_v46 = vadd.f32 %v155_v30, %v138_v18  ;;  %v158_v48 = vadd.f32 %v156_v34, %v139_v38 }
 0x12e   :  { %v189_v3 = vsel %vm623_vm6, %v187_v53, 0.0  ;;  %v190_v4 = vsel %vm636_vm9, %v188_v54, 0.0  ;;  %v333_v30 = vstv %s733_s28  ;;  %v272_v34 = vstv %s735_s29 }
 0x12f   :  { %v195_v20 = vmul.f32 %v595_v19, %v189_v3  ;;  %v196_v22 = vmul.f32 %v595_v19, %v190_v4  ;;  %v292_v18 = vshrl.u32 %v70_v25, 7  ;;  %v329_v38 = vstv %s739_s1 }
 0x130   :  { %v202_v63 = vpop.permute.xlu1 %201  ;;  %v200_v0 = vpop.permute.xlu0 %199 }
 0x131   :  { %v204_v13 = vsel %vm203_vm12, %v200_v0, %v202_v63  ;;  %v205_v14 = vsel %vm203_vm12, %v202_v63, %v200_v0  ;;  %v197_v40 = vadd.f32 %v195_v20, %v180_v17  ;;  %v198_v41 = vadd.f32 %v196_v22, %v181_v29 }
 0x132   :  { %v208_v16 = vsel %vm613_vm2, %v204_v13, 0.0  ;;  %v209_v35 = vsel %vm686_vm0, %v205_v14, 0.0  ;;  %vm256_vm2 = vcmask 1043456   ;;  %v498_v17 = vmov 1966171168  }
 0x133   :  { %v214_v45 = vmul.f32 %v601_v24, %v208_v16  ;;  %v215_v47 = vmul.f32 %v601_v24, %v209_v35  ;;  %v252_v54 = vadd.f32 %v197_v40, %v157_v46  ;;  %v253_v55 = vadd.f32 %v198_v41, %v158_v48 }
 0x134   :  { %v219_v26 = vpop.permute.xlu1 %218  ;;  %v217_v27 = vpop.permute.xlu0 %216  ;;  %v289_v20 = vunpack.c.l.s4 %v498_v17 }
 0x135   :  { %v221_v32 = vsel %vm220_vm14, %v217_v27, %v219_v26  ;;  %v222_v33 = vsel %vm220_vm14, %v219_v26, %v217_v27 }
 0x136   :  { %v224_v19 = vsel %vm100_vm11, %v222_v33, 0.0  ;;  %v229_v36 = vmul.f32 %v597_v21, %v221_v32  ;;  %v277_v32 = vmul.f32 %v276_v9, %v562_v11  ;;  %v278_v33 = vmul.f32 %v276_v9, %v567_v12 }
 0x137   :  { %v230_v37 = vmul.f32 %v597_v21, %v224_v19  ;;  %v290_v39 = vunpack.c.0.s8 %v289_v20 }
 0x138   :  { %v236_v43 = vpop.permute.xlu1 %235  ;;  %v234_v44 = vpop.permute.xlu0 %233  ;;  %v231_v51 = vadd.f32 %v229_v36, %v214_v45  ;;  %v334_v45 = vmul.f32 %v333_v30, %v562_v11 }
 0x139   :  { %v238_v21 = vsel %vm237_vm15, %v234_v44, %v236_v43  ;;  %v239_v31 = vsel %vm237_vm15, %v236_v43, %v234_v44  ;;  %v232_v52 = vadd.f32 %v230_v37, %v215_v47  ;;  %v280_v37 = vstv %s737_s0 }
 0x13a   :  { %v242_v49 = vsel %vm623_vm6, %v238_v21, 0.0  ;;  %v243_v50 = vsel %vm715_vm1, %v239_v31, 0.0  ;;  %v335_v47 = vmul.f32 %v333_v30, %v567_v12  ;;  %v337_v21 = vstv %s742_s30 }
 0x13b   :  { %v248_v53 = vmul.f32 %v599_v23, %v242_v49  ;;  %v249_v24 = vmul.f32 %v599_v23, %v243_v50  ;;  %v293_v50 = vsub.s32 %v290_v39, %v292_v18 }
 0x13d   :  { %v250_v56 = vadd.f32 %v248_v53, %v231_v51  ;;  %v251_v57 = vadd.f32 %v249_v24, %v232_v52 }
 0x13f   :  { %v254_v28 = vadd.f32 %v252_v54, %v250_v56  ;;  %v255_v58 = vadd.f32 %v253_v55, %v251_v57 }
 0x141   :  { %v257_v42 = vsel %vm256_vm2, %v254_v28, 0.0  ;;  %v264_v59 = vsel %vm256_vm2, %v255_v58, 0.0  ;;  %v310_v60 = vrot.slane %v254_v28, 4  ;;  %v311_v61 = vrot.slane %v255_v58, 4 }
 0x142   :  { %v258_v62 = vrot.slane %v257_v42, 4  ;;  %v265_v63 = vrot.slane %v264_v59, 4 }
 0x143   :  { %v314_v0 = vsel %vm256_vm2, %v310_v60, 0.0  ;;  %v321_v23 = vsel %vm256_vm2, %v311_v61, 0.0 }
 0x144   :  { %v259_v1 = vadd.f32 %v258_v62, %v257_v42  ;;  %v266_v2 = vadd.f32 %v265_v63, %v264_v59  ;;  %v315_v3 = vrot.slane %v314_v0, 4  ;;  %v322_v4 = vrot.slane %v321_v23, 4 }
 0x146   :  { %v260_v5 = vrot.slane %v259_v1, 2  ;;  %v267_v6 = vrot.slane %v266_v2, 2  ;;  %v316_v7 = vadd.f32 %v315_v3, %v314_v0  ;;  %v323_v8 = vadd.f32 %v322_v4, %v321_v23 }
 0x148   :  { %v261_v10 = vadd.f32 %v260_v5, %v259_v1  ;;  %v268_v13 = vadd.f32 %v267_v6, %v266_v2  ;;  %v317_v14 = vrot.slane %v316_v7, 2  ;;  %v324_v15 = vrot.slane %v323_v8, 2 }
 0x14a   :  { %v262_v22 = vrot.slane %v261_v10, 1  ;;  %v269_v26 = vrot.slane %v268_v13, 1  ;;  %v318_v27 = vadd.f32 %v317_v14, %v316_v7  ;;  %v325_v29 = vadd.f32 %v324_v15, %v323_v8 }
 0x14c   :  { %v263_v16 = vadd.f32 %v262_v22, %v261_v10  ;;  %v270_v35 = vadd.f32 %v269_v26, %v268_v13  ;;  %v319_v19 = vrot.slane %v318_v27, 1  ;;  %v326_v36 = vrot.slane %v325_v29, 1 }
 0x14e   :  { %v273_v40 = vadd.f32 %v272_v34, %v263_v16  ;;  %v274_v41 = vadd.f32 %v272_v34, %v270_v35  ;;  %v320_v43 = vadd.f32 %v319_v19, %v318_v27  ;;  %v327_v44 = vadd.f32 %v326_v36, %v325_v29 }
 0x150   :  { %v281_v31 = vmul.f32 %v280_v37, %v273_v40  ;;  %v282_v46 = vmul.f32 %v280_v37, %v274_v41  ;;  %v330_v48 = vadd.f32 %v329_v38, %v320_v43  ;;  %v331_v49 = vadd.f32 %v329_v38, %v327_v44 }
 0x152   :  { %v283_v51 = vadd.f32 %v281_v31, %v277_v32  ;;  %v284_v52 = vadd.f32 %v282_v46, %v278_v33  ;;  %v338_v53 = vmul.f32 %v337_v21, %v330_v48  ;;  %v339_v24 = vmul.f32 %v337_v21, %v331_v49 }
 0x154   :  { %v287_v54 = vcombine.low %v283_v51, %v284_v52  ;;  %v340_v55 = vadd.f32 %v338_v53, %v334_v45  ;;  %v341_v56 = vadd.f32 %v339_v24, %v335_v47 }
 0x156   :  { %v294_v57 = vrot.slane %v287_v54, %v293_v50  ;;  %v344_v28 = vcombine.high %v340_v55, %v341_v56 }
 0x158   :  { %v301_v11 = vrot.slane %v294_v57, %v293_v50  ;;  %v351_v12 = vrot.slane %v344_v28, %v293_v50 }
 0x15a   :  { %307 = vst.msk [vmem:[#allocation9] ss:$2 sm:$0x3] %vm305_vm3, %v301_v11  ;;  %v358_v58 = vrot.slane %v351_v12, %v293_v50 }
 0x15c   :  { %361 = vst.msk [vmem:[#allocation9 + $0x1] ss:$2 sm:$0x3] %vm305_vm3, %v358_v58 }
 0x15d   :  { %459 = shalt.err (!%p456_p3)
}
 0x15e   :  { %s460_s12 = scalar_lea.hbm %s773_s6, 64 }
 0x15f   :  { %p461_p4 = scmp.ne.s32.totalorder %s773_s6, %s460_s12  ;;  %p464_p5 = scmp.lt.u32.totalorder %s460_s12, %s773_s6 }
 0x161   :  { %p466_p6 = pnand %p464_p5, %p461_p4 }
 0x163   :  { %469 = shalt.err (!%p466_p6)
}
 0x164   :  { %371 = dma.vmem_to_hbm [thread:$0]  %s369_s8, 64, %s773_s6, [#allocation3]  }
 0x165   :  { %476 = dma.done.wait [#allocation3], 64  }
 0x166   :  { %477 = vsyncadd [#allocation3], 4294967232 }
 0x167   :  { %375 = vsyncpa [#allocation3], 1 }
 0x168   :  { %376 = vsyncpa [#allocation4], 1 }
 0x169   :  { %377 = vsyncpa [#allocation5], 1 }
 0x16a   :  { %378 = vsyncpa [#allocation7], 1 }

</bundles_post_ra>
